<compile_context>
chip_gen: v5e
topology: v5e:2x2
jax: 0.10.0
libtpu: 0.0.40
codegen_flags: <defaults>
</compile_context>

<pallas_src>
import jax
import jax.numpy as jnp
from jax.experimental import pallas as pl
from jax.experimental.pallas import tpu as pltpu


def _hybrid_embed_kernel(x_ref, w_ref, b_ref, o_ref):
    # One fused matmul on the MXU (bf16 in, f32 accumulate), f32 bias add,
    # bf16 store.
    acc = jnp.dot(x_ref[...], w_ref[...], preferred_element_type=jnp.float32)
    o_ref[...] = (acc + b_ref[...]).astype(o_ref.dtype)


def _is_v7x():
    try:
        return "v7" in jax.devices()[0].device_kind.lower()
    except Exception:  # pragma: no cover - defensive
        return False


def _pick_pack_factor(m_rows, k, e):
    """Fold P im2col rows into one kernel row (block-diagonal weight) so the
    lane (last) dims become dense.  P is capped at what lane density actually
    requires: kron(I_P, Wc) inflates the weight by P^2 and MXU MACs by P."""
    if k >= 128:
        return 1                      # already lane-dense; packing only costs
    target = -(-128 // k)             # ceil(128 / k)
    p = 1
    while p < target and p < 8:
        p *= 2
    while p > 1:
        kp, ep, mp = p * k, p * e, m_rows // p
        if (m_rows % p == 0 and mp % 8 == 0
                and kp <= 512
                and kp * ep * 2 <= (8 << 20)):   # packed bf16 weight <= 8 MiB
            return p
        p //= 2
    return 1


def _pick_row_tile(m_rows, megacore):
    """Largest 16-aligned row tile that divides m_rows.  Only on v7x (2 TCs)
    do we additionally require an even number (>= 2) of grid steps so both
    TensorCores get balanced work."""
    cands = [c for c in (2048, 1024, 512, 256, 128, 64, 32, 16, 8)
             if m_rows % c == 0]
    if megacore:
        for c in cands:
            steps = m_rows // c
            if steps >= 2 and steps % 2 == 0:
                return c
    if cands:
        return cands[0]
    return m_rows  # full-array block is always legal


@jax.jit
def hybrid_embed(x_nchw, w_backbone, b_backbone, w_proj, b_proj):
    """Forward pass of HybridEmbed (synthetic linear conv backbone).

    Args:
      x_nchw:     (B, C, H, W) float32 input image (NCHW, like PyTorch).
      w_backbone: (Fdim, C, 2, 2) backbone conv weight (stride 2).
      b_backbone: (Fdim,) backbone conv bias.
      w_proj:     (Edim, Fdim, 1, 1) 1x1 projection conv weight.
      b_proj:     (Edim,) projection conv bias.

    Returns:
      (B, Hf*Wf, Edim) bf16 embedding, Hf = H//2, Wf = W//2.
    """
    B, C, H, W = x_nchw.shape
    Fdim = w_backbone.shape[0]
    Edim = w_proj.shape[0]
    kh, kw = w_backbone.shape[2], w_backbone.shape[3]
    Hf, Wf = H // kh, W // kw
    num_patches = Hf * Wf
    M = B * num_patches
    K = C * kh * kw

    v7x = _is_v7x()

    # ---- fold the two linear layers into one matmul (backbone is linear) ----
    # TODO(synk): a real HybridEmbed backbone (BN/ReLU etc.) cannot be folded;
    # it would have to run as its own (XLA or Pallas) stage before this kernel.
    w1 = w_backbone.reshape(Fdim, K).T.astype(jnp.float32)        # (K, Fdim)
    w2 = w_proj.reshape(Edim, Fdim).T.astype(jnp.float32)         # (Fdim, Edim)
    wc = w1 @ w2                                                  # (K, Edim)
    bc = b_backbone.astype(jnp.float32) @ w2 + b_proj.astype(jnp.float32)

    # ---- lane-density packing: P rows per kernel row, block-diagonal weight
    P = _pick_pack_factor(M, K, Edim)
    Kp, Ep, Mp = P * K, P * Edim, M // P
    w_packed = jnp.kron(jnp.eye(P, dtype=jnp.float32), wc).astype(jnp.bfloat16)
    b_packed = jnp.tile(bc, P).reshape(1, Ep)                     # f32

    # ---- space-to-depth (im2col for the k=2/s=2 conv) ----
    # Crop odd trailing rows/cols (PyTorch's VALID stride-2 conv drops them).
    x = x_nchw[:, :, :Hf * kh, :Wf * kw]
    # Cast to bf16 BEFORE the reshape/transpose so any materialized im2col
    # intermediate is half the bytes; rows ordered (b, hf, wf), cols (c, kh, kw)
    # to match wc.  allow_input_fusion lets XLA fuse this into the input feed.
    x = x.astype(jnp.bfloat16)
    xm = x.reshape(B, C, Hf, kh, Wf, kw)
    xm = jnp.transpose(xm, (0, 2, 4, 1, 3, 5)).reshape(Mp, Kp)

    tm = _pick_row_tile(Mp, megacore=v7x)
    grid = (Mp // tm,)

    # Resident (constant index_map) weight/bias: single-buffer on v7x where
    # VMEM is the scarce resource (64 MiB physical).
    if v7x:
        w_spec = pl.BlockSpec((Kp, Ep), lambda i: (0, 0),
                              pipeline_mode=pl.Buffered(1))
        b_spec = pl.BlockSpec((1, Ep), lambda i: (0, 0),
                              pipeline_mode=pl.Buffered(1))
        w_bufs = 1
    else:
        w_spec = pl.BlockSpec((Kp, Ep), lambda i: (0, 0))
        b_spec = pl.BlockSpec((1, Ep), lambda i: (0, 0))
        w_bufs = 2

    # Explicit VMEM budget from actual tile sizes (+ headroom).
    per_call_bytes = (2 * tm * Kp * 2            # x tile, bf16, double-buffered
                      + 2 * tm * Ep * 2          # out tile, bf16, double-buffered
                      + w_bufs * (Kp * Ep * 2 + Ep * 4))
    vmem_limit = int(min(max(2 * per_call_bytes + (2 << 20), 16 << 20), 64 << 20))

    out = pl.pallas_call(
        _hybrid_embed_kernel,
        out_shape=jax.ShapeDtypeStruct((Mp, Ep), jnp.bfloat16),
        grid_spec=pltpu.PrefetchScalarGridSpec(
            num_scalar_prefetch=0,
            grid=grid,
            in_specs=[
                pl.BlockSpec((tm, Kp), lambda i: (i, 0)),    # packed im2col rows
                w_spec,                                      # fused block-diag weight
                b_spec,                                      # fused bias (f32)
            ],
            out_specs=pl.BlockSpec((tm, Ep), lambda i: (i, 0)),
        ),
        compiler_params=pltpu.CompilerParams(
            dimension_semantics=("parallel",),
            vmem_limit_bytes=vmem_limit,
            # Allow XLA to fuse the im2col transpose/reshape/cast producing
            # `xm` directly into the kernel's input feed.
            allow_input_fusion=[True, False, False],
        ),
    )(xm, w_packed, b_packed)

    # (Mp, Ep) row-major is byte-identical to (M, Edim) row-major.
    return out.reshape(B, num_patches, Edim)


def _reference(x_nchw, w_backbone, b_backbone, w_proj, b_proj):
    # pure-JAX f32 reference using conv_general_dilated (matches PyTorch conv2d)
    feat = jax.lax.conv_general_dilated(
        x_nchw, w_backbone, window_strides=(2, 2), padding="VALID",
        dimension_numbers=("NCHW", "OIHW", "NCHW"))
    feat = feat + b_backbone[None, :, None, None]
    proj = jax.lax.conv_general_dilated(
        feat, w_proj, window_strides=(1, 1), padding="VALID",
        dimension_numbers=("NCHW", "OIHW", "NCHW"))
    proj = proj + b_proj[None, :, None, None]
    B, E, Hf, Wf = proj.shape
    return jnp.transpose(proj.reshape(B, E, Hf * Wf), (0, 2, 1))


if __name__ == "__main__":
    # Small synthetic shapes consistent with the module:
    #   img_size=16, in_chans=4, backbone stride 2 -> feature_size=(8, 8),
    #   feature_dim=32, embed_dim=32, num_patches=64.
    B, C, H, W = 2, 4, 16, 16
    Fdim, Edim = 32, 32

    key = jax.random.PRNGKey(0)
    k_x, k_w1, k_b1, k_w2, k_b2 = jax.random.split(key, 5)

    x = jax.random.normal(k_x, (B, C, H, W), dtype=jnp.float32)
    w_backbone = jax.random.normal(k_w1, (Fdim, C, 2, 2), dtype=jnp.float32) * 0.1
    b_backbone = jax.random.normal(k_b1, (Fdim,), dtype=jnp.float32) * 0.1
    w_proj = jax.random.normal(k_w2, (Edim, Fdim, 1, 1), dtype=jnp.float32) * 0.1
    b_proj = jax.random.normal(k_b2, (Edim,), dtype=jnp.float32) * 0.1

    out = hybrid_embed(x, w_backbone, b_backbone, w_proj, b_proj)
    out = jax.block_until_ready(out)

    ref = _reference(x, w_backbone, b_backbone, w_proj, b_proj)
    assert out.shape == (B, (H // 2) * (W // 2), Edim), out.shape
    # bf16 activations/weights/output + algebraic fusion -> compare with
    # bf16-level tolerance against the f32 conv reference.
    assert jnp.allclose(out.astype(jnp.float32), ref, atol=3e-2, rtol=3e-2), \
        "mismatch vs reference"

    print("KERNEL_OK")
</pallas_src>

<mosaic_0001>
module attributes {stable_mosaic.version = 11 : i64} {
  func.func @_hybrid_embed_kernel(%arg0: i32, %arg1: memref<16x128xbf16, #tpu.memory_space<vmem>>, %arg2: memref<128x256xbf16, #tpu.memory_space<vmem>>, %arg3: memref<1x256xf32, #tpu.memory_space<vmem>>, %arg4: memref<16x256xbf16, #tpu.memory_space<vmem>>) attributes {dimension_semantics = [#tpu.dimension_semantics<parallel>], iteration_bounds = array<i64: 1>, scalar_prefetch = 0 : i64, scratch_operands = 0 : i64, tpu.core_type = #tpu.core_type<tc>, window_params = [{transform_indices = @transform_0, window_bounds = array<i64: 16, 128>}, {pipeline_mode = #tpu.pipeline_mode<synchronous>, transform_indices = @transform_1, window_bounds = array<i64: 128, 256>}, {pipeline_mode = #tpu.pipeline_mode<synchronous>, transform_indices = @transform_2, window_bounds = array<i64: 1, 256>}, {transform_indices = @transform_3, window_bounds = array<i64: 16, 256>}]} {
    %c0 = arith.constant 0 : index
    %c0_0 = arith.constant 0 : index
    %0 = vector.load %arg1[%c0, %c0_0] : memref<16x128xbf16, #tpu.memory_space<vmem>>, vector<16x128xbf16>
    %c0_1 = arith.constant 0 : index
    %c0_2 = arith.constant 0 : index
    %1 = vector.load %arg2[%c0_1, %c0_2] : memref<128x256xbf16, #tpu.memory_space<vmem>>, vector<128x256xbf16>
    %cst = arith.constant dense<0.000000e+00> : vector<16x256xf32>
    %2 = tpu.matmul %0, %1, %cst {dimension_numbers = #tpu.dot_dimension_numbers<[1], [0], [0], [1], [0, 0, 1, 1], [], []>} : vector<16x128xbf16>, vector<128x256xbf16>, vector<16x256xf32> -> vector<16x256xf32>
    %c0_3 = arith.constant 0 : index
    %c0_4 = arith.constant 0 : index
    %3 = vector.load %arg3[%c0_3, %c0_4] : memref<1x256xf32, #tpu.memory_space<vmem>>, vector<1x256xf32>
    %4 = vector.broadcast %3 : vector<1x256xf32> to vector<16x256xf32>
    %5 = arith.addf %2, %4 : vector<16x256xf32>
    %6 = arith.truncf %5 : vector<16x256xf32> to vector<16x256xbf16>
    %c0_5 = arith.constant 0 : index
    %c0_6 = arith.constant 0 : index
    %7 = vector.load %arg4[%c0_5, %c0_6] : memref<16x256xbf16, #tpu.memory_space<vmem>>, vector<16x256xbf16>
    tpu.vector_store %arg4[%c0_5, %c0_6], %6 {strides = array<i32>} : memref<16x256xbf16, #tpu.memory_space<vmem>>, vector<16x256xbf16>,
    return
  }
  func.func @transform_0(%arg0: i32) -> (i32, i32) {
    %c0_i32 = arith.constant 0 : i32
    %c0_i32_0 = arith.constant 0 : i32
    return %arg0, %c0_i32 : i32, i32
  }
  func.func @transform_1(%arg0: i32) -> (i32, i32) {
    %c0_i32 = arith.constant 0 : i32
    %c0_i32_0 = arith.constant 0 : i32
    %c0_i32_1 = arith.constant 0 : i32
    return %c0_i32, %c0_i32_0 : i32, i32
  }
  func.func @transform_2(%arg0: i32) -> (i32, i32) {
    %c0_i32 = arith.constant 0 : i32
    %c0_i32_0 = arith.constant 0 : i32
    %c0_i32_1 = arith.constant 0 : i32
    return %c0_i32, %c0_i32_0 : i32, i32
  }
  func.func @transform_3(%arg0: i32) -> (i32, i32) {
    %c0_i32 = arith.constant 0 : i32
    %c0_i32_0 = arith.constant 0 : i32
    return %arg0, %c0_i32 : i32, i32
  }
}

</mosaic_0001>

<bundles_post_ra>
// kernel: tile.8
= control target key start
LH: loop header
LB: loop body
LE: loop exit
PB: predicated region body
PF: predicated region fallthrough
CT: control target
= control target key end

     0   :  { %s22_s0 = inlined_call_operand.vmem [shape: f32[32], index: 0, kind: input, shape index: {}]   ;;  %s23_s1 = inlined_call_operand.vmem [shape: f32[8,32], index: 1, kind: output, shape index: {}]  }
   0x1   :  { %v4_v0 = vld [vmem:[%s22_s0] ss:$0 sm:$0xff] }
   0x2   :  { %5 = vst [vmem:[%s23_s1] sm:$0xff] %v4_v0 }

// kernel: tile.9
= control target key start
LH: loop header
LB: loop body
LE: loop exit
PB: predicated region body
PF: predicated region fallthrough
CT: control target
= control target key end

     0   :  { %s7_s6 = smov 3  ;;  %s46_s9 = smov 96   ;;  %vm4_vm0 = vcmask 261120   ;;  %vm11_vm1 = vcmask 1048320   ;;  %vm18_vm2 = vcmask 785920   ;;  %vm25_vm3 = vcmask 523520   ;;  %s77_s0 = inlined_call_operand.vmem [shape: f32[8,32], index: 0, kind: input, shape index: {}]   ;;  %s78_s1 = inlined_call_operand.vmem [shape: f32[1,256], index: 1, kind: output, shape index: {}]  }
   0x1   :  { %v39_v0 = vld [vmem:[%s77_s0 + $0x3] ss:$4 sm:%s7_s6]   ;;  %s21_s10 = smov 3  ;;  %s14_s13 = smov 3 }
   0x2   :  { %9 = vrot.lane.b32.xlu0 %v39_v0, %s46_s9  ;;  %v41_v1 = vld [vmem:[%s77_s0 + $0x1] ss:$4 sm:%s21_s10]   ;;  %s47_s14 = smov 32   ;;  %s48_s17 = smov 64  }
   0x3   :  { %23 = vrot.lane.b32.xlu1 %v41_v1, %s47_s14  ;;  %v40_v2 = vld [vmem:[%s77_s0 + $0x2] ss:$4 sm:%s14_s13]   ;;  %s2_s18 = smov 3 }
   0x4   :  { %v3_v3 = vld [vmem:[%s77_s0] ss:$4 sm:%s2_s18]  }
   0x5   :  { %5 = vst.msk [vmem:[#allocation0] ss:$8 sm:$0x3] %vm4_vm0, %v3_v3  }
   0xa   :  { %16 = vrot.lane.b32.xlu0 %v40_v2, %s48_s17 }
  0x74   :  { %v10_v4 = vpop.permute.xlu0 %9  }
  0x75   :  { %12 = vst.msk [vmem:[#allocation0] ss:$8 sm:$0x3] %vm11_vm1, %v10_v4   ;;  %v24_v5 = vpop.permute.xlu1 %23  }
  0x7c   :  { %v17_v6 = vpop.permute.xlu0 %16  }
  0x7d   :  { %19 = vst.msk [vmem:[#allocation0] ss:$8 sm:$0x3] %vm18_vm2, %v17_v6  }
  0x7e   :  { %26 = vst.msk [vmem:[#allocation0] ss:$8 sm:$0x3] %vm25_vm3, %v24_v5  }
  0x85   :  { %v29_v7 = vld [vmem:[#allocation0] sm:$0x1]  ;;  %v34_v8 = vld [vmem:[#allocation0 + $0x8] sm:$0x1] }
  0x86   :  { %32 = vst [vmem:[%s78_s1] sm:$0x1] %v29_v7 }
  0x87   :  { %42 = vst [vmem:[%s78_s1 + $0x1] sm:$0x1] %v34_v8 }

// kernel: hybrid_embed.1
= control target key start
LH: loop header
LB: loop body
LE: loop exit
PB: predicated region body
PF: predicated region fallthrough
CT: control target
= control target key end

     0   :  { %s373_s1 = inlined_call_operand.vmem [shape: bf16[128,256], index: 1, kind: input, shape index: {}]   ;;  %s374_s0 = inlined_call_operand.vmem [shape: bf16[16,128], index: 0, kind: input, shape index: {}]   ;;  %s375_s2 = inlined_call_operand.vmem [shape: f32[1,256], index: 2, kind: input, shape index: {}]   ;;  %s376_s3 = inlined_call_operand.vmem [shape: bf16[16,256], index: 3, kind: output, shape index: {}]  }
   0x1   :  { %v222_v0 = vld [vmem:[%s373_s1 + $0x70] sm:$0xf]  ;;  %v244_v1 = vld [vmem:[%s373_s1 + $0x74] sm:$0xf0]  ;;  %v243_v2 = vld [vmem:[%s373_s1 + $0x74] sm:$0xf] }
   0x2   :  { %v223_v3 = vor.u32 %v244_v1, %v222_v0  ;;  %v224_v4 = vld [vmem:[%s373_s1 + $0x78] sm:$0xf0]  ;;  %v214_v5 = vld [vmem:[%s373_s1 + $0x60] sm:$0xf]  ;;  %v242_v6 = vld [vmem:[%s373_s1 + $0x64] sm:$0xf0] }
   0x3   :  { %v227_v7 = vor.u32 %v243_v2, %v224_v4  ;;  %v241_v8 = vld [vmem:[%s373_s1 + $0x64] sm:$0xf]  ;;  %v216_v9 = vld [vmem:[%s373_s1 + $0x68] sm:$0xf0]  ;;  %v215_v10 = vor.u32 %v242_v6, %v214_v5  ;;  %v206_v12 = vld [vmem:[%s373_s1 + $0x50] sm:$0xf] }
   0x4   :  { %124 = vmatpush.bf16.msra.mxu0 %v223_v3  ;;  %v219_v11 = vor.u32 %v241_v8, %v216_v9  ;;  %v240_v13 = vld [vmem:[%s373_s1 + $0x54] sm:$0xf0]  ;;  %v239_v14 = vld [vmem:[%s373_s1 + $0x54] sm:$0xf]  ;;  %v208_v15 = vld [vmem:[%s373_s1 + $0x58] sm:$0xf0] }
   0x5   :  { %138 = vmatpush.bf16.msra.mxu1 %v227_v7  ;;  %v207_v16 = vor.u32 %v240_v13, %v206_v12  ;;  %v211_v17 = vor.u32 %v239_v14, %v208_v15  ;;  %v198_v18 = vld [vmem:[%s373_s1 + $0x40] sm:$0xf]  ;;  %v238_v19 = vld [vmem:[%s373_s1 + $0x44] sm:$0xf0]  ;;  %v237_v20 = vld [vmem:[%s373_s1 + $0x44] sm:$0xf] }
   0x6   :  { %v200_v21 = vld [vmem:[%s373_s1 + $0x48] sm:$0xf0]  ;;  %v199_v22 = vor.u32 %v238_v19, %v198_v18  ;;  %v190_v24 = vld [vmem:[%s373_s1 + $0x30] sm:$0xf]  ;;  %v236_v25 = vld [vmem:[%s373_s1 + $0x34] sm:$0xf0] }
   0x7   :  { %v203_v23 = vor.u32 %v237_v20, %v200_v21  ;;  %v235_v26 = vld [vmem:[%s373_s1 + $0x34] sm:$0xf]  ;;  %v192_v27 = vld [vmem:[%s373_s1 + $0x38] sm:$0xf0]  ;;  %v191_v28 = vor.u32 %v236_v25, %v190_v24  ;;  %v182_v30 = vld [vmem:[%s373_s1 + $0x20] sm:$0xf] }
   0x8   :  { %125 = vmatpush.bf16.msra.mxu0 %v215_v10  ;;  %v195_v29 = vor.u32 %v235_v26, %v192_v27  ;;  %v234_v31 = vld [vmem:[%s373_s1 + $0x24] sm:$0xf0]  ;;  %v233_v32 = vld [vmem:[%s373_s1 + $0x24] sm:$0xf]  ;;  %v184_v33 = vld [vmem:[%s373_s1 + $0x28] sm:$0xf0] }
   0x9   :  { %139 = vmatpush.bf16.msra.mxu1 %v219_v11  ;;  %v183_v34 = vor.u32 %v234_v31, %v182_v30  ;;  %v187_v35 = vor.u32 %v233_v32, %v184_v33  ;;  %v174_v36 = vld [vmem:[%s373_s1 + $0x10] sm:$0xf]  ;;  %v232_v37 = vld [vmem:[%s373_s1 + $0x14] sm:$0xf0]  ;;  %v231_v38 = vld [vmem:[%s373_s1 + $0x14] sm:$0xf] }
   0xa   :  { %v176_v39 = vld [vmem:[%s373_s1 + $0x18] sm:$0xf0]  ;;  %v175_v40 = vor.u32 %v232_v37, %v174_v36  ;;  %v166_v42 = vld [vmem:[%s373_s1] sm:$0xf]  ;;  %v230_v43 = vld [vmem:[%s373_s1 + $0x4] sm:$0xf0] }
   0xb   :  { %v179_v41 = vor.u32 %v231_v38, %v176_v39  ;;  %v229_v44 = vld [vmem:[%s373_s1 + $0x4] sm:$0xf]  ;;  %v168_v45 = vld [vmem:[%s373_s1 + $0x8] sm:$0xf0]  ;;  %v167_v46 = vor.u32 %v230_v43, %v166_v42  ;;  %v32_v49 = vld [vmem:[%s375_s2] sm:$0x3] }
   0xc   :  { %126 = vmatpush.bf16.msra.mxu0 %v207_v16  ;;  %v171_v47 = vor.u32 %v229_v44, %v168_v45  ;;  %v228_v48 = vld [vmem:[%s374_s0] sm:$0xff]  ;;  %v34_v50 = vperm.slane %v32_v49, 0  ;;  %v35_v51 = vperm.slane %v32_v49, 1 }
   0xd   :  { %140 = vmatpush.bf16.msra.mxu1 %v211_v17 }
  0x10   :  { %127 = vmatpush.bf16.msra.mxu0 %v199_v22 }
  0x11   :  { %141 = vmatpush.bf16.msra.mxu1 %v203_v23 }
  0x14   :  { %128 = vmatpush.bf16.msra.mxu0 %v191_v28 }
  0x15   :  { %142 = vmatpush.bf16.msra.mxu1 %v195_v29 }
  0x18   :  { %129 = vmatpush.bf16.msra.mxu0 %v183_v34 }
  0x19   :  { %143 = vmatpush.bf16.msra.mxu1 %v187_v35 }
  0x1c   :  { %130 = vmatpush.bf16.msra.mxu0 %v175_v40 }
  0x1d   :  { %144 = vmatpush.bf16.msra.mxu1 %v179_v41 }
  0x20   :  { %131 = vmatpush.bf16.msra.mxu0 %v167_v46 }
  0x21   :  { %145 = vmatpush.bf16.msra.mxu1 %v171_v47 }
  0x23   :  { %132 = vmatmul.bf16.vlgmr.msra.gmra.mxu0 %v228_v48 }
  0x24   :  { %146 = vmatmul.bf16.vlgmr.msra.gmra.mxu1 %v228_v48 }
  0xa0   :  { %v133_v52 = vpop.f32.mrf.mxu0 }
  0xa1   :  { %v134_v53 = vadd.f32 %v133_v52, %v34_v50  ;;  %v147_v54 = vpop.f32.mrf.mxu1 }
  0xa2   :  { %v148_v55 = vadd.f32 %v147_v54, %v35_v51 }
  0xa4   :  { %v152_v56 = vpack.c.bf16 %v148_v55, %v134_v53 }
  0xa6   :  { %154 = vst [vmem:[%s376_s3] sm:$0xff] %v152_v56 }
  0xa8   :  { %v135_v57 = vpop.f32.mrf.mxu0 }
  0xa9   :  { %v136_v58 = vadd.f32 %v135_v57, %v34_v50  ;;  %v149_v59 = vpop.f32.mrf.mxu1 }
  0xaa   :  { %v150_v60 = vadd.f32 %v149_v59, %v35_v51 }
  0xac   :  { %v153_v61 = vpack.c.bf16 %v150_v60, %v136_v58 }
  0xae   :  { %155 = vst [vmem:[%s376_s3 + $0x8] sm:$0xff] %v153_v61 }

</bundles_post_ra>
